<compile_context>
chip_gen: v7x
topology: tpu7x:2x2x1
jax: 0.10.0
libtpu: 0.0.40
codegen_flags: <defaults>
</compile_context>

<pallas_src>
import functools

import jax
import jax.numpy as jnp
from jax.experimental import pallas as pl
from jax.experimental.pallas import tpu as pltpu

N_IN = 256
N_HID = 256
N_CLASSES = 10
N_PAD = 128  # lane-dense padded class dimension


def _round_up(n, m):
    return ((n + m - 1) // m) * m


def _fc_output_kernel(x_ref, keep_ref, w2_ref, b2_ref, w3_ref, b3_ref, out_ref):
    # fc2: (TB, 256)bf16 @ (256, 256)bf16 -> f32 accumulate
    h = jnp.dot(x_ref[...], w2_ref[...], preferred_element_type=jnp.float32)
    h = h + b2_ref[...]
    # relu
    h = jnp.maximum(h, 0.0)
    # dropout: keep mask is 0/1 (train) or 0.5 (eval); the 1/(1-p)=2 scale is
    # folded into w3, so a plain multiply suffices here.
    h = h * keep_ref[...]
    # fc3: (TB, 256)bf16 @ (256, 128)bf16 -> f32; pad lanes of w3 are zero.
    logits = jnp.dot(h.astype(jnp.bfloat16), w3_ref[...],
                     preferred_element_type=jnp.float32)
    logits = logits + b3_ref[...]  # pad-lane bias is -1e30
    # log_softmax over the (padded, lane-dense) class axis; pad lanes
    # contribute exp(-1e30 - m) == 0 to the normalizer.
    m = jnp.max(logits, axis=-1, keepdims=True)
    shifted = logits - m
    lse = jnp.log(jnp.sum(jnp.exp(shifted), axis=-1, keepdims=True))
    out_ref[...] = shifted - lse


@functools.partial(jax.jit, static_argnames=("tile_b", "train"))
def fc_output_model(x, w2_t, b2, w3_pad, b3_pad, key, *, tile_b=512, train=True):
    B = x.shape[0]
    tile_b = min(tile_b, _round_up(B, 16))
    Bp = _round_up(B, tile_b)

    # dropout keep mask (p = 0.5).  In eval mode, 0.5 * (2 * w3) == identity.
    if train:
        keep = jax.random.bernoulli(key, 0.5, (Bp, N_HID)).astype(jnp.float32)
    else:
        keep = jnp.full((Bp, N_HID), 0.5, jnp.float32)

    xb = x.astype(jnp.bfloat16)
    if Bp != B:
        xb = jnp.pad(xb, ((0, Bp - B), (0, 0)))

    grid = (Bp // tile_b,)
    out = pl.pallas_call(
        _fc_output_kernel,
        out_shape=jax.ShapeDtypeStruct((Bp, N_PAD), jnp.float32),
        grid=grid,
        in_specs=[
            pl.BlockSpec((tile_b, N_IN), lambda i: (i, 0)),    # x (batch-tiled)
            pl.BlockSpec((tile_b, N_HID), lambda i: (i, 0)),   # keep mask
            pl.BlockSpec((N_IN, N_HID), lambda i: (0, 0)),     # w2 (resident)
            pl.BlockSpec((1, N_HID), lambda i: (0, 0)),        # b2 (resident)
            pl.BlockSpec((N_HID, N_PAD), lambda i: (0, 0)),    # w3 (resident)
            pl.BlockSpec((1, N_PAD), lambda i: (0, 0)),        # b3 (resident)
        ],
        out_specs=pl.BlockSpec((tile_b, N_PAD), lambda i: (i, 0)),
        compiler_params=pltpu.CompilerParams(
            dimension_semantics=("parallel",)),
    )(xb, keep, w2_t, b2, w3_pad, b3_pad)

    return out[:B, :N_CLASSES]


def init_params(key):
    """Deterministic init mimicking PyTorch nn.Linear defaults:
    uniform(-1/sqrt(fan_in), 1/sqrt(fan_in)) for weight and bias."""
    k1, k2, k3, k4 = jax.random.split(key, 4)
    bound = 1.0 / jnp.sqrt(float(N_IN))
    w2 = jax.random.uniform(k1, (N_HID, N_IN), jnp.float32, -bound, bound)  # (out, in)
    b2 = jax.random.uniform(k2, (N_HID,), jnp.float32, -bound, bound)
    w3 = jax.random.uniform(k3, (N_CLASSES, N_HID), jnp.float32, -bound, bound)
    b3 = jax.random.uniform(k4, (N_CLASSES,), jnp.float32, -bound, bound)
    return w2, b2, w3, b3


def prepare_params(w2, b2, w3, b3):
    """Pre-transpose to (in, out), cast matmul operands to bf16, fold the
    dropout 1/(1-p)=2 scale into w3, and pad fc3 to 128 lanes."""
    w2_t = w2.T.astype(jnp.bfloat16)                         # (256, 256)
    b2r = b2.reshape(1, N_HID).astype(jnp.float32)           # (1, 256)
    w3_t = (2.0 * w3.T).astype(jnp.bfloat16)                 # (256, 10), scale folded
    w3_pad = jnp.zeros((N_HID, N_PAD), jnp.bfloat16).at[:, :N_CLASSES].set(w3_t)
    b3_pad = jnp.full((1, N_PAD), -1e30, jnp.float32).at[0, :N_CLASSES].set(
        b3.astype(jnp.float32))
    return w2_t, b2r, w3_pad, b3_pad


if __name__ == "__main__":
    key = jax.random.PRNGKey(0)
    kx, kp, kd = jax.random.split(key, 3)

    B = 8  # small demo batch; feature dim 256 is fixed by the module
    x = jax.random.normal(kx, (B, N_IN), jnp.float32)
    params = prepare_params(*init_params(kp))

    out = fc_output_model(x, *params, kd, tile_b=512, train=True)
    out = jax.block_until_ready(out)

    assert out.shape == (B, N_CLASSES)
    # rows of log_softmax must sum (in prob space) to ~1
    row_sums = jnp.sum(jnp.exp(out), axis=1)
    assert jnp.allclose(row_sums, jnp.ones_like(row_sums), atol=1e-3), row_sums

    print("KERNEL_OK")
</pallas_src>

<mosaic_0001>
module attributes {stable_mosaic.version = 11 : i64} {
  func.func @_fc_output_kernel(%arg0: i32, %arg1: memref<16x256xbf16, #tpu.memory_space<vmem>>, %arg2: memref<16x256xf32, #tpu.memory_space<vmem>>, %arg3: memref<256x256xbf16, #tpu.memory_space<vmem>>, %arg4: memref<1x256xf32, #tpu.memory_space<vmem>>, %arg5: memref<256x128xbf16, #tpu.memory_space<vmem>>, %arg6: memref<1x128xf32, #tpu.memory_space<vmem>>, %arg7: memref<16x128xf32, #tpu.memory_space<vmem>>) attributes {dimension_semantics = [#tpu.dimension_semantics<parallel>], iteration_bounds = array<i64: 1>, scalar_prefetch = 0 : i64, scratch_operands = 0 : i64, tpu.core_type = #tpu.core_type<tc>, window_params = [{transform_indices = @transform_0, window_bounds = array<i64: 16, 256>}, {transform_indices = @transform_1, window_bounds = array<i64: 16, 256>}, {pipeline_mode = #tpu.pipeline_mode<synchronous>, transform_indices = @transform_2, window_bounds = array<i64: 256, 256>}, {pipeline_mode = #tpu.pipeline_mode<synchronous>, transform_indices = @transform_3, window_bounds = array<i64: 1, 256>}, {pipeline_mode = #tpu.pipeline_mode<synchronous>, transform_indices = @transform_4, window_bounds = array<i64: 256, 128>}, {pipeline_mode = #tpu.pipeline_mode<synchronous>, transform_indices = @transform_5, window_bounds = array<i64: 1, 128>}, {transform_indices = @transform_6, window_bounds = array<i64: 16, 128>}]} {
    %c0 = arith.constant 0 : index
    %c0_0 = arith.constant 0 : index
    %0 = vector.load %arg1[%c0, %c0_0] : memref<16x256xbf16, #tpu.memory_space<vmem>>, vector<16x256xbf16>
    %c0_1 = arith.constant 0 : index
    %c0_2 = arith.constant 0 : index
    %1 = vector.load %arg3[%c0_1, %c0_2] : memref<256x256xbf16, #tpu.memory_space<vmem>>, vector<256x256xbf16>
    %cst = arith.constant dense<0.000000e+00> : vector<16x256xf32>
    %2 = tpu.matmul %0, %1, %cst {dimension_numbers = #tpu.dot_dimension_numbers<[1], [0], [0], [1], [0, 0, 1, 1], [], []>} : vector<16x256xbf16>, vector<256x256xbf16>, vector<16x256xf32> -> vector<16x256xf32>
    %c0_3 = arith.constant 0 : index
    %c0_4 = arith.constant 0 : index
    %3 = vector.load %arg4[%c0_3, %c0_4] : memref<1x256xf32, #tpu.memory_space<vmem>>, vector<1x256xf32>
    %4 = vector.broadcast %3 : vector<1x256xf32> to vector<16x256xf32>
    %5 = arith.addf %2, %4 : vector<16x256xf32>
    %cst_5 = arith.constant 0.000000e+00 : f32
    %6 = vector.broadcast %cst_5 : f32 to vector<16x256xf32>
    %7 = arith.maximumf %5, %6 : vector<16x256xf32>
    %c0_6 = arith.constant 0 : index
    %c0_7 = arith.constant 0 : index
    %8 = vector.load %arg2[%c0_6, %c0_7] : memref<16x256xf32, #tpu.memory_space<vmem>>, vector<16x256xf32>
    %9 = arith.mulf %7, %8 : vector<16x256xf32>
    %10 = arith.truncf %9 : vector<16x256xf32> to vector<16x256xbf16>
    %c0_8 = arith.constant 0 : index
    %c0_9 = arith.constant 0 : index
    %11 = vector.load %arg5[%c0_8, %c0_9] : memref<256x128xbf16, #tpu.memory_space<vmem>>, vector<256x128xbf16>
    %cst_10 = arith.constant dense<0.000000e+00> : vector<16x128xf32>
    %12 = tpu.matmul %10, %11, %cst_10 {dimension_numbers = #tpu.dot_dimension_numbers<[1], [0], [0], [1], [0, 0, 1, 1], [], []>} : vector<16x256xbf16>, vector<256x128xbf16>, vector<16x128xf32> -> vector<16x128xf32>
    %c0_11 = arith.constant 0 : index
    %c0_12 = arith.constant 0 : index
    %13 = vector.load %arg6[%c0_11, %c0_12] : memref<1x128xf32, #tpu.memory_space<vmem>>, vector<1x128xf32>
    %14 = vector.broadcast %13 : vector<1x128xf32> to vector<16x128xf32>
    %15 = arith.addf %12, %14 : vector<16x128xf32>
    %cst_13 = arith.constant dense<0xFF800000> : vector<16xf32>
    %16 = vector.multi_reduction <maximumf>, %15, %cst_13 [1] : vector<16x128xf32> to vector<16xf32>
    %17 = vector.shape_cast %16 : vector<16xf32> to vector<16x1xf32>
    %18 = vector.broadcast %17 : vector<16x1xf32> to vector<16x128xf32>
    %19 = arith.subf %15, %18 : vector<16x128xf32>
    %20 = math.exp %19 : vector<16x128xf32>
    %cst_14 = arith.constant dense<0.000000e+00> : vector<16xf32>
    %21 = vector.multi_reduction <add>, %20, %cst_14 [1] : vector<16x128xf32> to vector<16xf32>
    %22 = vector.shape_cast %21 : vector<16xf32> to vector<16x1xf32>
    %23 = math.log %22 : vector<16x1xf32>
    %24 = vector.broadcast %23 : vector<16x1xf32> to vector<16x128xf32>
    %25 = arith.subf %19, %24 : vector<16x128xf32>
    %c0_15 = arith.constant 0 : index
    %c0_16 = arith.constant 0 : index
    %26 = vector.load %arg7[%c0_15, %c0_16] : memref<16x128xf32, #tpu.memory_space<vmem>>, vector<16x128xf32>
    tpu.vector_store %arg7[%c0_15, %c0_16], %25 {strides = array<i32>} : memref<16x128xf32, #tpu.memory_space<vmem>>, vector<16x128xf32>,
    return
  }
  func.func @transform_0(%arg0: i32) -> (i32, i32) {
    %c0_i32 = arith.constant 0 : i32
    %c0_i32_0 = arith.constant 0 : i32
    return %arg0, %c0_i32 : i32, i32
  }
  func.func @transform_1(%arg0: i32) -> (i32, i32) {
    %c0_i32 = arith.constant 0 : i32
    %c0_i32_0 = arith.constant 0 : i32
    return %arg0, %c0_i32 : i32, i32
  }
  func.func @transform_2(%arg0: i32) -> (i32, i32) {
    %c0_i32 = arith.constant 0 : i32
    %c0_i32_0 = arith.constant 0 : i32
    %c0_i32_1 = arith.constant 0 : i32
    return %c0_i32, %c0_i32_0 : i32, i32
  }
  func.func @transform_3(%arg0: i32) -> (i32, i32) {
    %c0_i32 = arith.constant 0 : i32
    %c0_i32_0 = arith.constant 0 : i32
    %c0_i32_1 = arith.constant 0 : i32
    return %c0_i32, %c0_i32_0 : i32, i32
  }
  func.func @transform_4(%arg0: i32) -> (i32, i32) {
    %c0_i32 = arith.constant 0 : i32
    %c0_i32_0 = arith.constant 0 : i32
    %c0_i32_1 = arith.constant 0 : i32
    return %c0_i32, %c0_i32_0 : i32, i32
  }
  func.func @transform_5(%arg0: i32) -> (i32, i32) {
    %c0_i32 = arith.constant 0 : i32
    %c0_i32_0 = arith.constant 0 : i32
    %c0_i32_1 = arith.constant 0 : i32
    return %c0_i32, %c0_i32_0 : i32, i32
  }
  func.func @transform_6(%arg0: i32) -> (i32, i32) {
    %c0_i32 = arith.constant 0 : i32
    %c0_i32_0 = arith.constant 0 : i32
    return %arg0, %c0_i32 : i32, i32
  }
}

</mosaic_0001>

<bundles_post_ra>
// kernel: fc_output_model.1
= control target key start
LH: loop header
LB: loop body
LE: loop exit
PB: predicated region body
PF: predicated region fallthrough
CT: control target
= control target key end

     0   :  { %11 = vsyncpa [#allocation3], 0  ;;  %s689_s21 = smov [#allocation2]   ;;  %s817_s0 = inlined_call_operand.vmem [shape: bf16[16,256], index: 0, kind: input, shape index: {}]   ;;  %s818_s1 = inlined_call_operand.vmem [shape: f32[16,256], index: 1, kind: input, shape index: {}]   ;;  %s819_s2 = inlined_call_operand.hbm [shape: bf16[256,256], index: 2, kind: input, shape index: {}]   ;;  %s820_s3 = inlined_call_operand.vmem [shape: f32[1,256], index: 3, kind: input, shape index: {}]   ;;  %s821_s4 = inlined_call_operand.vmem [shape: bf16[256,128], index: 4, kind: input, shape index: {}]   ;;  %s822_s5 = inlined_call_operand.vmem [shape: f32[1,128], index: 5, kind: input, shape index: {}]   ;;  %s823_s6 = inlined_call_operand.vmem [shape: f32[16,128], index: 6, kind: output, shape index: {}]  }
   0x1   :  { %s21_s22 = sshll.u32 %s689_s21, 4  ;;  %s665_s25 = scalar_lea.hbm %s819_s2, 4096  ;;  %s22_s22 = int_to_ptr.vmem [resolvable:$true] %s21_s22 }
   0x2   :  { %p666_p0 = scmp.ne.s32.totalorder %s819_s2, %s665_s25  ;;  %p669_p1 = scmp.lt.u32.totalorder %s665_s25, %s819_s2 }
   0x4   :  { %p671_p2 = pnand %p669_p1, %p666_p0 }
   0x6   :  { %674 = shalt.err (!%p671_p2)
}
   0x7   :  { %s675_s30 = scalar_lea.vmem %s22_s22, 4096  ;;  %p680_p4 = scmp.lt.s32.totalorder %s22_s22, %s22_s22 }
   0x8   :  { %p676_p3 = scmp.ne.s32.totalorder %s22_s22, %s675_s30  ;;  %p681_p5 = scmp.lt.s32.totalorder %s675_s30, %s675_s30 }
   0xa   :  { %p682_p6 = por %p681_p5, %p680_p4 }
   0xc   :  { %p683_p7 = pnand %p682_p6, %p676_p3 }
   0xe   :  { %686 = shalt.err (!%p683_p7)
}
   0xf   :  { %s690_s7 = smov 128   ;;  %s691_s8 = smov 8  }
  0x10   :  { %27 = dma.hbm_to_vmem [thread:$0]  %s819_s2, 4096, %s22_s22, [#allocation3], %s690_s7, %s690_s7, %s691_s8  }
  0x11   :  { %687 = dma.done.wait [#allocation3], 4096  }
  0x12   :  { %688 = vsyncadd [#allocation3], 4294963200  ;;  %v590_v0 = vld [vmem:[#allocation2 + $0x4] ss:$8 sps:$4 sm:$0xff]   ;;  %v592_v1 = vld [vmem:[#allocation2] ss:$8 sps:$4 sm:$0xff]   ;;  %v74_v50 = vlaneseq }
  0x13   :  { %254 = vmatprep.subr.bf16.mxu0 %v590_v0  ;;  %v593_v2 = vld [vmem:[#allocation2 + $0x14] ss:$8 sps:$4 sm:$0xff]   ;;  %v595_v3 = vld [vmem:[#allocation2 + $0x10] ss:$8 sps:$4 sm:$0xff]   ;;  %v596_v4 = vld [vmem:[#allocation2 + $0x24] ss:$8 sps:$4 sm:$0xff]  }
  0x14   :  { %255 = vmatpush1.bf16.msra.mxu0 %v592_v1  ;;  %v598_v5 = vld [vmem:[#allocation2 + $0x20] ss:$8 sps:$4 sm:$0xff]   ;;  %v599_v6 = vld [vmem:[#allocation2 + $0x34] ss:$8 sps:$4 sm:$0xff]   ;;  %v601_v7 = vld [vmem:[#allocation2 + $0x30] ss:$8 sps:$4 sm:$0xff]  }
  0x15   :  { %256 = vmatprep.subr.bf16.mxu0 %v593_v2  ;;  %v602_v8 = vld [vmem:[#allocation2 + $0x44] ss:$8 sps:$4 sm:$0xff]   ;;  %v604_v9 = vld [vmem:[#allocation2 + $0x40] ss:$8 sps:$4 sm:$0xff]   ;;  %v605_v10 = vld [vmem:[#allocation2 + $0x54] ss:$8 sps:$4 sm:$0xff]  }
  0x16   :  { %v607_v11 = vld [vmem:[#allocation2 + $0x50] ss:$8 sps:$4 sm:$0xff]   ;;  %v608_v12 = vld [vmem:[#allocation2 + $0x64] ss:$8 sps:$4 sm:$0xff]   ;;  %v610_v13 = vld [vmem:[#allocation2 + $0x60] ss:$8 sps:$4 sm:$0xff]  }
  0x17   :  { %v611_v14 = vld [vmem:[#allocation2 + $0x74] ss:$8 sps:$4 sm:$0xff]   ;;  %v640_v15 = vld [vmem:[%s817_s0 + $0x4] ss:$8 sps:$4 sm:$0xff]   ;;  %v613_v18 = vld [vmem:[#allocation2 + $0x70] ss:$8 sps:$4 sm:$0xff]  }
  0x18   :  { %257 = vmatpush1.bf16.msra.mxu0 %v595_v3  ;;  %v641_v16 = vld [vmem:[%s821_s4 + $0x40] sm:$0xff]   ;;  %286 = vmatprep.mubr.bf16.mxu0 %v640_v15  ;;  %v643_v19 = vld [vmem:[%s821_s4 + $0x48] sm:$0xff]   ;;  %v645_v21 = vld [vmem:[%s821_s4 + $0x50] sm:$0xff]   ;;  %v75_v51 = vshrl.u32 %v74_v50, 7 }
  0x19   :  { %258 = vmatprep.subr.bf16.mxu0 %v596_v4  ;;  %v642_v17 = vld [vmem:[%s821_s4] sm:$0xff]   ;;  %565 = vmatprep.subr.bf16.mxu1 %v641_v16  ;;  %v644_v20 = vld [vmem:[%s821_s4 + $0x8] sm:$0xff]   ;;  %v646_v24 = vld [vmem:[%s821_s4 + $0x10] sm:$0xff]  }
  0x1a   :  { %566 = vmatpush3.bf16.msra.mxu1 %v642_v17  ;;  %v614_v22 = vld [vmem:[#allocation2 + $0x84] ss:$8 sps:$4 sm:$0xff]   ;;  %v616_v23 = vld [vmem:[#allocation2 + $0x80] ss:$8 sps:$4 sm:$0xff]   ;;  %v647_v25 = vld [vmem:[%s821_s4 + $0x58] sm:$0xff]   ;;  %v76_v52 = vsub.s32 0, %v75_v51 }
  0x1b   :  { %567 = vmatprep.subr.bf16.mxu1 %v643_v19  ;;  %v617_v26 = vld [vmem:[#allocation2 + $0x94] ss:$8 sps:$4 sm:$0xff]   ;;  %v619_v28 = vld [vmem:[#allocation2 + $0x90] ss:$8 sps:$4 sm:$0xff]   ;;  %v649_v29 = vld [vmem:[%s821_s4 + $0x60] sm:$0xff]   ;;  %v80_v54 = vsub.s32 1, %v75_v51 }
  0x1c   :  { %259 = vmatpush1.bf16.msra.mxu0 %v598_v5  ;;  %v648_v27 = vld [vmem:[%s821_s4 + $0x18] sm:$0xff]   ;;  %v620_v30 = vld [vmem:[#allocation2 + $0xa4] ss:$8 sps:$4 sm:$0xff]   ;;  %v622_v32 = vld [vmem:[#allocation2 + $0xa0] ss:$8 sps:$4 sm:$0xff]  }
  0x1d   :  { %260 = vmatprep.subr.bf16.mxu0 %v599_v6  ;;  %v650_v31 = vld [vmem:[%s821_s4 + $0x20] sm:$0xff]   ;;  %v623_v33 = vld [vmem:[#allocation2 + $0xb4] ss:$8 sps:$4 sm:$0xff]   ;;  %v625_v34 = vld [vmem:[#allocation2 + $0xb0] ss:$8 sps:$4 sm:$0xff]  }
  0x1e   :  { %568 = vmatpush3.bf16.msra.mxu1 %v644_v20  ;;  %v626_v35 = vld [vmem:[#allocation2 + $0xc4] ss:$8 sps:$4 sm:$0xff]   ;;  %v628_v36 = vld [vmem:[#allocation2 + $0xc0] ss:$8 sps:$4 sm:$0xff]   ;;  %v629_v37 = vld [vmem:[#allocation2 + $0xd4] ss:$8 sps:$4 sm:$0xff]  }
  0x1f   :  { %569 = vmatprep.subr.bf16.mxu1 %v645_v21  ;;  %v631_v38 = vld [vmem:[#allocation2 + $0xd0] ss:$8 sps:$4 sm:$0xff]   ;;  %v632_v39 = vld [vmem:[#allocation2 + $0xe4] ss:$8 sps:$4 sm:$0xff]   ;;  %v634_v40 = vld [vmem:[#allocation2 + $0xe0] ss:$8 sps:$4 sm:$0xff]  }
  0x20   :  { %261 = vmatpush1.bf16.msra.mxu0 %v601_v7  ;;  %v635_v41 = vld [vmem:[#allocation2 + $0xf4] ss:$8 sps:$4 sm:$0xff]   ;;  %v637_v42 = vld [vmem:[#allocation2 + $0xf0] ss:$8 sps:$4 sm:$0xff]   ;;  %v638_v43 = vld [vmem:[%s817_s0] ss:$8 sps:$4 sm:$0xff]  }
  0x21   :  { %262 = vmatprep.subr.bf16.mxu0 %v602_v8  ;;  %v651_v44 = vld [vmem:[%s821_s4 + $0x68] sm:$0xff]   ;;  %v653_v46 = vld [vmem:[%s821_s4 + $0x70] sm:$0xff]   ;;  %v655_v48 = vld [vmem:[%s821_s4 + $0x78] sm:$0xff]  }
  0x22   :  { %570 = vmatpush3.bf16.msra.mxu1 %v646_v24  ;;  %v652_v45 = vld [vmem:[%s821_s4 + $0x28] sm:$0xff]   ;;  %v654_v47 = vld [vmem:[%s821_s4 + $0x30] sm:$0xff]   ;;  %v656_v49 = vld [vmem:[%s821_s4 + $0x38] sm:$0xff]  }
  0x23   :  { %571 = vmatprep.subr.bf16.mxu1 %v647_v25  ;;  %v72_v53 = vld [vmem:[%s820_s3] sm:$0x3]  ;;  %v303_v3 = vld [vmem:[%s818_s1 + $0x10] sm:$0xff]  ;;  %v302_v6 = vld [vmem:[%s818_s1 + $0x8] sm:$0xff] }
  0x24   :  { %263 = vmatpush1.bf16.msra.mxu0 %v604_v9  ;;  %v77_v55 = vrot.slane %v72_v53, %v76_v52  ;;  %v81_v56 = vrot.slane %v72_v53, %v80_v54  ;;  %v301_v1 = vld [vmem:[%s818_s1] sm:$0xff]  ;;  %v304_v7 = vld [vmem:[%s818_s1 + $0x18] sm:$0xff] }
  0x25   :  { %264 = vmatprep.subr.bf16.mxu0 %v605_v10  ;;  %v548_v17 = vld [vmem:[%s822_s5] ss:$0 sm:$0xff] }
  0x26   :  { %572 = vmatpush3.bf16.msra.mxu1 %v648_v27 }
  0x27   :  { %573 = vmatprep.subr.bf16.mxu1 %v649_v29 }
  0x28   :  { %265 = vmatpush1.bf16.msra.mxu0 %v607_v11 }
  0x29   :  { %266 = vmatprep.subr.bf16.mxu0 %v608_v12 }
  0x2a   :  { %574 = vmatpush3.bf16.msra.mxu1 %v650_v31 }
  0x2b   :  { %575 = vmatprep.subr.bf16.mxu1 %v651_v44 }
  0x2c   :  { %267 = vmatpush1.bf16.msra.mxu0 %v610_v13 }
  0x2d   :  { %268 = vmatprep.subr.bf16.mxu0 %v611_v14 }
  0x2e   :  { %576 = vmatpush3.bf16.msra.mxu1 %v652_v45 }
  0x2f   :  { %577 = vmatprep.subr.bf16.mxu1 %v653_v46 }
  0x30   :  { %269 = vmatpush1.bf16.msra.mxu0 %v613_v18 }
  0x31   :  { %270 = vmatprep.subr.bf16.mxu0 %v614_v22 }
  0x32   :  { %578 = vmatpush3.bf16.msra.mxu1 %v654_v47 }
  0x33   :  { %579 = vmatprep.subr.bf16.mxu1 %v655_v48 }
  0x34   :  { %271 = vmatpush1.bf16.msra.mxu0 %v616_v23 }
  0x35   :  { %272 = vmatprep.subr.bf16.mxu0 %v617_v26 }
  0x36   :  { %580 = vmatpush3.bf16.msra.mxu1 %v656_v49 }
  0x38   :  { %273 = vmatpush1.bf16.msra.mxu0 %v619_v28 }
  0x39   :  { %274 = vmatprep.subr.bf16.mxu0 %v620_v30 }
  0x3c   :  { %275 = vmatpush1.bf16.msra.mxu0 %v622_v32 }
  0x3d   :  { %276 = vmatprep.subr.bf16.mxu0 %v623_v33 }
  0x40   :  { %277 = vmatpush1.bf16.msra.mxu0 %v625_v34 }
  0x41   :  { %278 = vmatprep.subr.bf16.mxu0 %v626_v35 }
  0x44   :  { %279 = vmatpush1.bf16.msra.mxu0 %v628_v36 }
  0x45   :  { %280 = vmatprep.subr.bf16.mxu0 %v629_v37 }
  0x48   :  { %281 = vmatpush1.bf16.msra.mxu0 %v631_v38 }
  0x49   :  { %282 = vmatprep.subr.bf16.mxu0 %v632_v39 }
  0x4c   :  { %283 = vmatpush1.bf16.msra.mxu0 %v634_v40 }
  0x4d   :  { %284 = vmatprep.subr.bf16.mxu0 %v635_v41 }
  0x50   :  { %285 = vmatpush1.bf16.msra.mxu0 %v637_v42 }
  0x53   :  { %287 = vmatmul.mubr.bf16.vlgmr.msra.gmra.mrb[0].mxu0 %v638_v43 }
 0x126   :  { %v288_v57 = vpop.f32.mrb[0].mxu0 }
 0x127   :  { %v289_v58 = vadd.f32 %v288_v57, %v77_v55  ;;  %v290_v59 = vpop.f32.mrb[1].mxu0 }
 0x128   :  { %v291_v60 = vadd.f32 %v290_v59, %v81_v56  ;;  %v292_v61 = vpop.f32.mrb[2].mxu0 }
 0x129   :  { %v297_v62 = vmax.f32 %v289_v58, 0.0  ;;  %v293_v63 = vadd.f32 %v292_v61, %v77_v55  ;;  %v294_v0 = vpop.f32.mrb[3].mxu0 }
 0x12a   :  { %v298_v2 = vmax.f32 %v291_v60, 0.0  ;;  %v295_v4 = vadd.f32 %v294_v0, %v81_v56 }
 0x12b   :  { %v299_v5 = vmax.f32 %v293_v63, 0.0  ;;  %v305_v9 = vmul.f32 %v301_v1, %v297_v62 }
 0x12c   :  { %v300_v8 = vmax.f32 %v295_v4, 0.0  ;;  %v306_v11 = vmul.f32 %v302_v6, %v298_v2 }
 0x12d   :  { %v307_v10 = vmul.f32 %v303_v3, %v299_v5 }
 0x12e   :  { %v308_v12 = vmul.f32 %v304_v7, %v300_v8 }
 0x12f   :  { %v309_v13 = vpack.c.bf16 %v307_v10, %v305_v9 }
 0x130   :  { %v310_v14 = vpack.c.bf16 %v308_v12, %v306_v11 }
 0x132   :  { %478 = vmatprep.mubr.bf16.mxu1 %v310_v14 }
 0x133   :  { %479 = vmatmul.mubr.bf16.vlgmr.msra.gmra.mrb[0].mxu1 %v309_v13 }
 0x206   :  { %v581_v15 = vpop.f32.mrb[0].mxu1 }
 0x207   :  { %v582_v16 = vpop.f32.mrb[1].mxu1 }
 0x208   :  { %v583_v18 = vadd.f32 %v582_v16, %v581_v15  ;;  %v584_v19 = vpop.f32.mrb[2].mxu1 }
 0x209   :  { %v585_v20 = vpop.f32.mrb[3].mxu1 }
 0x20a   :  { %v586_v21 = vadd.f32 %v585_v20, %v584_v19  ;;  %v481_v22 = vadd.f32 %v583_v18, %v548_v17 }
 0x20c   :  { %487 = vmax.xlane.f32.xlu0 %v481_v22  ;;  %v484_v23 = vadd.f32 %v586_v21, %v548_v17 }
 0x210   :  { %489 = vmax.xlane.f32.xlu0 %v484_v23 }
 0x299   :  { %v488_v24 = vpop.xlane.xlu0 %487 }
 0x29a   :  { %v491_v25 = vsub.f32 %v481_v22, %v488_v24 }
 0x29c   :  { %v493_v26 = vmul.f32 1.442695, %v491_v25 }
 0x29d   :  { %v490_v27 = vpop.xlane.xlu0 %489 }
 0x29e   :  { %v492_v28 = vsub.f32 %v484_v23, %v490_v27  ;;  %657 = vpow2.f32 %v493_v26 }
 0x2a0   :  { %v495_v29 = vmul.f32 1.442695, %v492_v28 }
 0x2a2   :  { %659 = vpow2.f32 %v495_v29 }
 0x2a8   :  { %v658_v30 = vpop.eup %657 }
 0x2a9   :  { %497 = vadd.xlane.f32.xlu1 %v658_v30 }
 0x2ac   :  { %v660_v31 = vpop.eup %659 }
 0x2ad   :  { %499 = vadd.xlane.f32.xlu1 %v660_v31 }
 0x336   :  { %v498_v32 = vpop.xlane.xlu1 %497 }
 0x337   :  { %661 = vlog2.f32 %v498_v32 }
 0x33a   :  { %v500_v33 = vpop.xlane.xlu1 %499 }
 0x33b   :  { %663 = vlog2.f32 %v500_v33 }
 0x341   :  { %v662_v34 = vpop.eup %661 }
 0x342   :  { %v502_v35 = vmul.f32 0.6931472, %v662_v34 }
 0x344   :  { %v505_v36 = vsub.f32 %v491_v25, %v502_v35 }
 0x345   :  { %v664_v37 = vpop.eup %663 }
 0x346   :  { %507 = vst [vmem:[%s823_s6] sm:$0xff] %v505_v36  ;;  %v504_v38 = vmul.f32 0.6931472, %v664_v37 }
 0x348   :  { %v506_v39 = vsub.f32 %v492_v28, %v504_v38 }
 0x34a   :  { %508 = vst [vmem:[%s823_s6 + $0x8] sm:$0xff] %v506_v39 }
 0x34b   :  { %513 = vsyncpa [#allocation3], 1 }

</bundles_post_ra>
